<compile_context>
chip_gen: v7x
topology: tpu7x:2x2x1
jax: 0.10.0
libtpu: 0.0.40
codegen_flags: <defaults>
</compile_context>

<pallas_src>
import jax
import jax.numpy as jnp
from jax.experimental import pallas as pl
from jax.experimental.pallas import tpu as pltpu

HEADS1 = 2                 # conv1 heads
OUT1 = 16                  # conv1 out channels per head
HID1 = HEADS1 * OUT1       # 32
AUG1 = HID1 + 1            # z plus ones column (softmax denominator via MXU)
NEG_SLOPE = 0.2            # GATConv default negative_slope
DEN_EPS = 1e-30            # guards exp-underflow rows (global-max shift caveat)


def _round_up(a, b):
    return (a + b - 1) // b * b


def _tpu_budget():
    """Per-generation tile sizes / VMEM limit (v5e/v6e: 128 MiB, v7x: 64 MiB)."""
    cap = 64 << 20
    try:
        info = pltpu.get_tpu_info()
        cap = int(getattr(info, "vmem_capacity_bytes", cap))
    except Exception:
        pass
    big = cap >= (100 << 20)
    row_tile = 256 if big else 128          # amortize per-step overhead on big-VMEM gens
    src_chunk = 2048 if big else 1024       # bounds [TM, TK] temporaries on v7x
    vmem_limit = max(32 << 20, int(cap * 3 // 4))   # ~96 MiB v5e/v6e, ~48 MiB v7x
    return row_tile, src_chunk, vmem_limit


# ----------------------------------------------------------------------------
# Kernel 1: fused input projection, row-tiled.
#   out = x_aug @ [W1 | ones-col | W1@a_dst | W1@a_src]   (x_aug = [x | 1])
#   -> zaug = [z | 1] (bf16, MXU RHS for gat1), e_dst [N,2], e_src [N,2]
# ----------------------------------------------------------------------------
def _proj_kernel(xaug_ref, wfull_ref, zaug_ref, edst_ref, esrc_ref):
    out = jnp.dot(xaug_ref[...], wfull_ref[...], preferred_element_type=jnp.float32)
    zaug_ref[...] = out[:, :AUG1].astype(jnp.bfloat16)
    edst_ref[...] = out[:, AUG1:AUG1 + HEADS1]
    esrc_ref[...] = out[:, AUG1 + HEADS1:AUG1 + 2 * HEADS1]


# ----------------------------------------------------------------------------
# Kernel 2: GATConv1 (heads=2, concat) + ReLU + (@W2), grid = (row tiles, src chunks).
# Accumulates p @ [z | 1] per chunk (numerator + denominator in one MXU dot);
# finalizes with the per-head softmax normalization, bias, ReLU and the 32->1
# projection of conv2, so h1 never touches HBM.
# ----------------------------------------------------------------------------
def _gat1_kernel(adj_ref, edst_ref, zaug_ref, esrcT_ref, msrc_ref, b1_ref, w2_ref,
                 z2_ref, acc0_ref, acc1_ref):
    k = pl.program_id(1)

    @pl.when(k == 0)
    def _():
        acc0_ref[...] = jnp.zeros_like(acc0_ref)
        acc1_ref[...] = jnp.zeros_like(acc1_ref)

    maskf = adj_ref[...].astype(jnp.float32)          # [TM, TK]; reused by both heads
    zaug = zaug_ref[...]                              # [TK, 33] bf16
    edst = edst_ref[...]                              # [TM, 2] f32
    # Upper-bound shift m_i = LeakyReLU(e_dst[i] + max_j e_src[j]); valid because
    # LeakyReLU is monotone -> shifted logits <= 0, exp <= 1 (no per-tile XLU max).
    mrow = edst + msrc_ref[...]                       # [TM, 2]
    mrow = jnp.where(mrow > 0, mrow, NEG_SLOPE * mrow)

    for h in range(HEADS1):                           # static unroll (2 heads)
        logits = edst[:, h:h + 1] + esrcT_ref[h:h + 1, :]       # [TM,1]+[1,TK]
        logits = jnp.where(logits > 0, logits, NEG_SLOPE * logits)
        p = (jnp.exp(logits - mrow[:, h:h + 1]) * maskf).astype(jnp.bfloat16)
        acc = acc0_ref if h == 0 else acc1_ref
        # numerator (32 z-columns) AND softmax denominator (ones column) in one dot
        acc[...] += jnp.dot(p, zaug, preferred_element_type=jnp.float32)

    @pl.when(k == pl.num_programs(1) - 1)
    def _():
        z2 = jnp.zeros((z2_ref.shape[0], 1), jnp.float32)
        for h in range(HEADS1):
            acc = acc0_ref if h == 0 else acc1_ref
            den = jnp.maximum(acc[:, HID1:HID1 + 1], DEN_EPS)
            hh = acc[:, h * OUT1:(h + 1) * OUT1] * pl.reciprocal(den, approx=True)
            hh = jnp.maximum(hh + b1_ref[:, h * OUT1:(h + 1) * OUT1], 0.0)
            z2 = z2 + jnp.dot(hh, w2_ref[h * OUT1:(h + 1) * OUT1, :],
                              preferred_element_type=jnp.float32)
        # TODO(synk): a lane-dense [1, TM] output would replace these masked
        #             (tm,1) stores; kept column-major to avoid an in-kernel transpose.
        z2_ref[...] = z2


# ----------------------------------------------------------------------------
# Kernel 3: GATConv2 (1 head, concat=False) + validity-masked per-row graph
# contributions, same (row tiles, src chunks) accumulation pattern.
# ----------------------------------------------------------------------------
def _gat2_kernel(adj_ref, edst2_ref, esrc2_ref, zaug2_ref, scal_ref, valid_ref,
                 out_ref, acc_ref):
    k = pl.program_id(1)

    @pl.when(k == 0)
    def _():
        acc_ref[...] = jnp.zeros_like(acc_ref)

    maskf = adj_ref[...].astype(jnp.float32)
    logits = edst2_ref[...] + esrc2_ref[...]                 # [TM,1] + [1,TK]
    logits = jnp.where(logits > 0, logits, NEG_SLOPE * logits)
    mrow = edst2_ref[...] + scal_ref[:, 0:1]                 # [TM,1] upper-bound shift
    mrow = jnp.where(mrow > 0, mrow, NEG_SLOPE * mrow)
    p = (jnp.exp(logits - mrow) * maskf).astype(jnp.bfloat16)
    acc_ref[...] += jnp.dot(p, zaug2_ref[...], preferred_element_type=jnp.float32)

    @pl.when(k == pl.num_programs(1) - 1)
    def _():
        den = jnp.maximum(acc_ref[:, 1:2], DEN_EPS)
        out = acc_ref[:, 0:1] * pl.reciprocal(den, approx=True) + scal_ref[:, 1:2]
        out_ref[...] = out * valid_ref[...]   # padded rows contribute 0 to the graph sum


def init_params(key, in_channels):
    ks = jax.random.split(key, 6)
    w1 = 0.1 * jax.random.normal(ks[0], (in_channels, HID1), jnp.float32)
    att_src1 = 0.1 * jax.random.normal(ks[1], (HEADS1, OUT1), jnp.float32)
    att_dst1 = 0.1 * jax.random.normal(ks[2], (HEADS1, OUT1), jnp.float32)
    # Block-diagonal [32, 2] layout so per-head scores come from one matmul.
    asrc1 = jnp.zeros((HID1, HEADS1), jnp.float32)
    adst1 = jnp.zeros((HID1, HEADS1), jnp.float32)
    for h in range(HEADS1):
        asrc1 = asrc1.at[h * OUT1:(h + 1) * OUT1, h].set(att_src1[h])
        adst1 = adst1.at[h * OUT1:(h + 1) * OUT1, h].set(att_dst1[h])
    b1 = jnp.zeros((1, HID1), jnp.float32)
    w2 = 0.1 * jax.random.normal(ks[3], (HID1, 1), jnp.float32)
    asrc2 = 0.1 * jax.random.normal(ks[4], (1, 1), jnp.float32)
    adst2 = 0.1 * jax.random.normal(ks[5], (1, 1), jnp.float32)
    b2 = jnp.zeros((1, 1), jnp.float32)
    return dict(w1=w1, asrc1=asrc1, adst1=adst1, b1=b1,
                w2=w2, asrc2=asrc2, adst2=adst2, b2=b2)


def critic_forward(x, edge_index, params, *, row_tile=None, src_chunk=None):
    """x: [N, F] float, edge_index: [2, E] int (row 0 = src, row 1 = dst)."""
    n, f = x.shape
    rt_def, sc_def, vlim = _tpu_budget()
    row_tile = rt_def if row_tile is None else row_tile
    src_chunk = sc_def if src_chunk is None else src_chunk

    # Tile / padding choices: tk is a multiple of tm, n_pad a multiple of tk, so
    # every block is either (8,128)-aligned or equal to the full array dims.
    if n <= 128:
        tm = _round_up(max(n, 8), 8)
        tk = tm
        n_pad = tm
    else:
        tm = row_tile
        tk = min(_round_up(src_chunk, tm), _round_up(n, tm))
        n_pad = _round_up(n, tk)
    num_m = n_pad // tm
    num_k = n_pad // tk

    # Dense adjacency mask (dst <- src) + self loops, built directly in int8.
    # TODO(synk): duplicate/parallel edges collapse to one mask entry; PyG's
    #             edge-list softmax would weight parallel edges separately.
    # TODO(synk): bit-packed uint8 adjacency (8 cols/byte, in-kernel shift/and)
    #             would cut the HBM stream a further 8x.
    src, dst = edge_index[0], edge_index[1]
    diag = jnp.arange(n_pad)
    adj = jnp.zeros((n_pad, n_pad), jnp.int8)
    adj = adj.at[diag, diag].set(1)
    adj = adj.at[dst, src].set(1)

    # [x | 1] so the ones (denominator) column of zaug comes out of the same matmul.
    x_pad = jnp.zeros((n_pad, f + 1), jnp.float32).at[:n, :f].set(x.astype(jnp.float32))
    x_pad = x_pad.at[:, f].set(1.0)
    valid = (jnp.arange(n_pad) < n).astype(jnp.float32)[:, None]   # [Np, 1]

    # Fused projection weights (tiny parameter preprocessing).
    w1, asrc1, adst1 = params['w1'], params['asrc1'], params['adst1']
    wfull = jnp.concatenate([
        jnp.concatenate([w1, jnp.zeros((f, 1), jnp.float32), w1 @ adst1, w1 @ asrc1],
                        axis=1),
        jnp.concatenate([jnp.zeros((1, HID1), jnp.float32), jnp.ones((1, 1), jnp.float32),
                         jnp.zeros((1, 2 * HEADS1), jnp.float32)], axis=1),
    ], axis=0)                                                     # [F+1, 37]

    cparams1 = pltpu.CompilerParams(dimension_semantics=("parallel",),
                                    vmem_limit_bytes=vlim)
    cparams2 = pltpu.CompilerParams(dimension_semantics=("parallel", "arbitrary"),
                                    vmem_limit_bytes=vlim)

    # ---- kernel 1: fused projections, row-tiled ------------------------------
    zaug1, edst1, esrc1 = pl.pallas_call(
        _proj_kernel,
        grid=(num_m,),
        in_specs=[pl.BlockSpec((tm, f + 1), lambda i: (i, 0)),
                  pl.BlockSpec((f + 1, AUG1 + 2 * HEADS1), lambda i: (0, 0))],
        out_specs=(pl.BlockSpec((tm, AUG1), lambda i: (i, 0)),
                   pl.BlockSpec((tm, HEADS1), lambda i: (i, 0)),
                   pl.BlockSpec((tm, HEADS1), lambda i: (i, 0))),
        out_shape=(jax.ShapeDtypeStruct((n_pad, AUG1), jnp.bfloat16),
                   jax.ShapeDtypeStruct((n_pad, HEADS1), jnp.float32),
                   jax.ShapeDtypeStruct((n_pad, HEADS1), jnp.float32)),
        compiler_params=cparams1,
    )(x_pad, wfull)

    esrc1T = esrc1.T                                   # [2, Np] (tiny layout plumbing)
    maxsrc1 = jnp.max(esrc1, axis=0, keepdims=True)    # [1, 2] global upper bound / head

    # ---- kernel 2: GATConv1 + relu + @W2 -------------------------------------
    z2 = pl.pallas_call(
        _gat1_kernel,
        grid=(num_m, num_k),
        in_specs=[
            pl.BlockSpec((tm, tk), lambda i, k: (i, k)),          # adj (int8)
            pl.BlockSpec((tm, HEADS1), lambda i, k: (i, 0)),      # e_dst rows
            pl.BlockSpec((tk, AUG1), lambda i, k: (k, 0)),        # [z | 1] chunk (bf16)
            pl.BlockSpec((HEADS1, tk), lambda i, k: (0, k)),      # e_src lane-major chunk
            pl.BlockSpec((1, HEADS1), lambda i, k: (0, 0)),       # max_j e_src per head
            pl.BlockSpec((1, HID1), lambda i, k: (0, 0)),         # b1
            pl.BlockSpec((HID1, 1), lambda i, k: (0, 0)),         # w2
        ],
        out_specs=pl.BlockSpec((tm, 1), lambda i, k: (i, 0)),
        out_shape=jax.ShapeDtypeStruct((n_pad, 1), jnp.float32),
        scratch_shapes=[pltpu.VMEM((tm, AUG1), jnp.float32),
                        pltpu.VMEM((tm, AUG1), jnp.float32)],
        compiler_params=cparams2,
    )(adj, edst1, zaug1, esrc1T, maxsrc1, params['b1'], params['w2'])

    # Tiny O(N) layer-2 score prep in the wrapper.
    asrc2 = params['asrc2'].reshape(())
    adst2 = params['adst2'].reshape(())
    edst2 = adst2 * z2                                             # [Np, 1]
    esrc2 = asrc2 * z2                                             # [Np, 1]
    esrc2T = esrc2.T                                               # [1, Np]
    zaug2 = jnp.concatenate([z2, jnp.ones_like(z2)], axis=1).astype(jnp.bfloat16)
    scal2 = jnp.concatenate([jnp.max(esrc2).reshape(1, 1),
                             params['b2'].reshape(1, 1)], axis=1)  # [[max e_src2, b2]]

    # ---- kernel 3: GATConv2, per-row graph contributions ---------------------
    rows = pl.pallas_call(
        _gat2_kernel,
        grid=(num_m, num_k),
        in_specs=[
            pl.BlockSpec((tm, tk), lambda i, k: (i, k)),          # adj (int8)
            pl.BlockSpec((tm, 1), lambda i, k: (i, 0)),           # e_dst2 rows
            pl.BlockSpec((1, tk), lambda i, k: (0, k)),           # e_src2 lane-major chunk
            pl.BlockSpec((tk, 2), lambda i, k: (k, 0)),           # [z2 | 1] chunk (bf16)
            pl.BlockSpec((1, 2), lambda i, k: (0, 0)),            # [max e_src2, b2]
            pl.BlockSpec((tm, 1), lambda i, k: (i, 0)),           # valid rows
        ],
        out_specs=pl.BlockSpec((tm, 1), lambda i, k: (i, 0)),
        out_shape=jax.ShapeDtypeStruct((n_pad, 1), jnp.float32),
        scratch_shapes=[pltpu.VMEM((tm, 2), jnp.float32)],
        compiler_params=cparams2,
    )(adj, edst2, esrc2T, zaug2, scal2, valid)

    # 'graph' branch: x.sum(dim=0, keepdim=True)
    # TODO(synk): batched scatter(x, index, reduce='sum') branch not implemented.
    return jnp.sum(rows, axis=0, keepdims=True)                    # [1, 1]


if __name__ == "__main__":
    key = jax.random.PRNGKey(0)
    k_x, k_e, k_p = jax.random.split(key, 3)

    N = 8            # number of graph nodes
    IN_CHANNELS = 4  # node feature dim
    E = 16           # number of directed edges

    x = jax.random.normal(k_x, (N, IN_CHANNELS), jnp.float32)
    edge_index = jax.random.randint(k_e, (2, E), 0, N, dtype=jnp.int32)
    params = init_params(k_p, IN_CHANNELS)

    out = jax.jit(critic_forward)(x, edge_index, params)
    out = jax.block_until_ready(out)
    assert out.shape == (1, 1) and out.dtype == jnp.float32
    print("KERNEL_OK")
</pallas_src>

<mosaic_0001>
module attributes {stable_mosaic.version = 11 : i64} {
  func.func @_proj_kernel(%arg0: i32, %arg1: memref<8x5xf32, #tpu.memory_space<vmem>>, %arg2: memref<5x37xf32, #tpu.memory_space<vmem>>, %arg3: memref<8x33xbf16, #tpu.memory_space<vmem>>, %arg4: memref<8x2xf32, #tpu.memory_space<vmem>>, %arg5: memref<8x2xf32, #tpu.memory_space<vmem>>) attributes {dimension_semantics = [#tpu.dimension_semantics<parallel>], iteration_bounds = array<i64: 1>, scalar_prefetch = 0 : i64, scratch_operands = 0 : i64, tpu.core_type = #tpu.core_type<tc>, window_params = [{transform_indices = @transform_0, window_bounds = array<i64: 8, 5>}, {pipeline_mode = #tpu.pipeline_mode<synchronous>, transform_indices = @transform_1, window_bounds = array<i64: 5, 37>}, {transform_indices = @transform_2, window_bounds = array<i64: 8, 33>}, {transform_indices = @transform_3, window_bounds = array<i64: 8, 2>}, {transform_indices = @transform_4, window_bounds = array<i64: 8, 2>}]} {
    %c0 = arith.constant 0 : index
    %c0_0 = arith.constant 0 : index
    %0 = vector.load %arg1[%c0, %c0_0] : memref<8x5xf32, #tpu.memory_space<vmem>>, vector<8x5xf32>
    %c0_1 = arith.constant 0 : index
    %c0_2 = arith.constant 0 : index
    %1 = vector.load %arg2[%c0_1, %c0_2] : memref<5x37xf32, #tpu.memory_space<vmem>>, vector<5x37xf32>
    %cst = arith.constant dense<0.000000e+00> : vector<8x37xf32>
    %2 = tpu.matmul %0, %1, %cst {dimension_numbers = #tpu.dot_dimension_numbers<[1], [0], [0], [1], [0, 0, 1, 1], [], []>} : vector<8x5xf32>, vector<5x37xf32>, vector<8x37xf32> -> vector<8x37xf32>
    %3 = vector.extract_strided_slice %2 {offsets = [0, 0], sizes = [8, 33], strides = [1, 1]} : vector<8x37xf32> to vector<8x33xf32>
    %4 = arith.truncf %3 : vector<8x33xf32> to vector<8x33xbf16>
    %c0_3 = arith.constant 0 : index
    %c0_4 = arith.constant 0 : index
    %5 = vector.load %arg3[%c0_3, %c0_4] : memref<8x33xbf16, #tpu.memory_space<vmem>>, vector<8x33xbf16>
    tpu.vector_store %arg3[%c0_3, %c0_4], %4 {strides = array<i32>} : memref<8x33xbf16, #tpu.memory_space<vmem>>, vector<8x33xbf16>,
    %6 = vector.extract_strided_slice %2 {offsets = [0, 33], sizes = [8, 2], strides = [1, 1]} : vector<8x37xf32> to vector<8x2xf32>
    %c0_5 = arith.constant 0 : index
    %c0_6 = arith.constant 0 : index
    %7 = vector.load %arg4[%c0_5, %c0_6] : memref<8x2xf32, #tpu.memory_space<vmem>>, vector<8x2xf32>
    tpu.vector_store %arg4[%c0_5, %c0_6], %6 {strides = array<i32>} : memref<8x2xf32, #tpu.memory_space<vmem>>, vector<8x2xf32>,
    %8 = vector.extract_strided_slice %2 {offsets = [0, 35], sizes = [8, 2], strides = [1, 1]} : vector<8x37xf32> to vector<8x2xf32>
    %c0_7 = arith.constant 0 : index
    %c0_8 = arith.constant 0 : index
    %9 = vector.load %arg5[%c0_7, %c0_8] : memref<8x2xf32, #tpu.memory_space<vmem>>, vector<8x2xf32>
    tpu.vector_store %arg5[%c0_7, %c0_8], %8 {strides = array<i32>} : memref<8x2xf32, #tpu.memory_space<vmem>>, vector<8x2xf32>,
    return
  }
  func.func @transform_0(%arg0: i32) -> (i32, i32) {
    %c0_i32 = arith.constant 0 : i32
    %c0_i32_0 = arith.constant 0 : i32
    return %arg0, %c0_i32 : i32, i32
  }
  func.func @transform_1(%arg0: i32) -> (i32, i32) {
    %c0_i32 = arith.constant 0 : i32
    %c0_i32_0 = arith.constant 0 : i32
    %c0_i32_1 = arith.constant 0 : i32
    return %c0_i32, %c0_i32_0 : i32, i32
  }
  func.func @transform_2(%arg0: i32) -> (i32, i32) {
    %c0_i32 = arith.constant 0 : i32
    %c0_i32_0 = arith.constant 0 : i32
    return %arg0, %c0_i32 : i32, i32
  }
  func.func @transform_3(%arg0: i32) -> (i32, i32) {
    %c0_i32 = arith.constant 0 : i32
    %c0_i32_0 = arith.constant 0 : i32
    return %arg0, %c0_i32 : i32, i32
  }
  func.func @transform_4(%arg0: i32) -> (i32, i32) {
    %c0_i32 = arith.constant 0 : i32
    %c0_i32_0 = arith.constant 0 : i32
    return %arg0, %c0_i32 : i32, i32
  }
}

module attributes {stable_mosaic.version = 11 : i64} {
  func.func @_gat1_kernel(%arg0: i32, %arg1: i32, %arg2: memref<8x8xi8, #tpu.memory_space<vmem>>, %arg3: memref<8x2xf32, #tpu.memory_space<vmem>>, %arg4: memref<8x33xbf16, #tpu.memory_space<vmem>>, %arg5: memref<2x8xf32, #tpu.memory_space<vmem>>, %arg6: memref<1x2xf32, #tpu.memory_space<vmem>>, %arg7: memref<1x32xf32, #tpu.memory_space<vmem>>, %arg8: memref<32x1xf32, #tpu.memory_space<vmem>>, %arg9: memref<8x1xf32, #tpu.memory_space<vmem>>, %arg10: memref<8x33xf32, #tpu.memory_space<vmem>>, %arg11: memref<8x33xf32, #tpu.memory_space<vmem>>) attributes {dimension_semantics = [#tpu.dimension_semantics<parallel>, #tpu.dimension_semantics<arbitrary>], iteration_bounds = array<i64: 1, 1>, scalar_prefetch = 0 : i64, scratch_operands = 2 : i64, tpu.core_type = #tpu.core_type<tc>, window_params = [{transform_indices = @transform_0, window_bounds = array<i64: 8, 8>}, {transform_indices = @transform_1, window_bounds = array<i64: 8, 2>}, {transform_indices = @transform_2, window_bounds = array<i64: 8, 33>}, {transform_indices = @transform_3, window_bounds = array<i64: 2, 8>}, {pipeline_mode = #tpu.pipeline_mode<synchronous>, transform_indices = @transform_4, window_bounds = array<i64: 1, 2>}, {pipeline_mode = #tpu.pipeline_mode<synchronous>, transform_indices = @transform_5, window_bounds = array<i64: 1, 32>}, {pipeline_mode = #tpu.pipeline_mode<synchronous>, transform_indices = @transform_6, window_bounds = array<i64: 32, 1>}, {transform_indices = @transform_7, window_bounds = array<i64: 8, 1>}]} {
    %c0_i32 = arith.constant 0 : i32
    %0 = arith.cmpi eq, %arg1, %c0_i32 : i32
    %1 = arith.extui %0 : i1 to i32
    %c0_i32_0 = arith.constant 0 : i32
    %2 = arith.cmpi ne, %1, %c0_i32_0 : i32
    scf.if %2 {
      %cst_28 = arith.constant 0.000000e+00 : f32
      %58 = vector.broadcast %cst_28 : f32 to vector<8x33xf32>
      %c0_29 = arith.constant 0 : index
      %c0_30 = arith.constant 0 : index
      %59 = vector.load %arg10[%c0_29, %c0_30] : memref<8x33xf32, #tpu.memory_space<vmem>>, vector<8x33xf32>
      tpu.vector_store %arg10[%c0_29, %c0_30], %58 {strides = array<i32>} : memref<8x33xf32, #tpu.memory_space<vmem>>, vector<8x33xf32>,
      %cst_31 = arith.constant 0.000000e+00 : f32
      %60 = vector.broadcast %cst_31 : f32 to vector<8x33xf32>
      %c0_32 = arith.constant 0 : index
      %c0_33 = arith.constant 0 : index
      %61 = vector.load %arg11[%c0_32, %c0_33] : memref<8x33xf32, #tpu.memory_space<vmem>>, vector<8x33xf32>
      tpu.vector_store %arg11[%c0_32, %c0_33], %60 {strides = array<i32>} : memref<8x33xf32, #tpu.memory_space<vmem>>, vector<8x33xf32>,
    } else {
    }
    %c0 = arith.constant 0 : index
    %c0_1 = arith.constant 0 : index
    %3 = vector.load %arg2[%c0, %c0_1] : memref<8x8xi8, #tpu.memory_space<vmem>>, vector<8x8xi8>
    %4 = arith.sitofp %3 : vector<8x8xi8> to vector<8x8xf32>
    %c0_2 = arith.constant 0 : index
    %c0_3 = arith.constant 0 : index
    %5 = vector.load %arg4[%c0_2, %c0_3] : memref<8x33xbf16, #tpu.memory_space<vmem>>, vector<8x33xbf16>
    %c0_4 = arith.constant 0 : index
    %c0_5 = arith.constant 0 : index
    %6 = vector.load %arg3[%c0_4, %c0_5] : memref<8x2xf32, #tpu.memory_space<vmem>>, vector<8x2xf32>
    %c0_6 = arith.constant 0 : index
    %c0_7 = arith.constant 0 : index
    %7 = vector.load %arg6[%c0_6, %c0_7] : memref<1x2xf32, #tpu.memory_space<vmem>>, vector<1x2xf32>
    %8 = vector.broadcast %7 : vector<1x2xf32> to vector<8x2xf32>
    %9 = arith.addf %6, %8 : vector<8x2xf32>
    %cst = arith.constant 0.000000e+00 : f32
    %10 = vector.broadcast %cst : f32 to vector<8x2xf32>
    %11 = arith.cmpf ogt, %9, %10 : vector<8x2xf32>
    %cst_8 = arith.constant 2.000000e-01 : f32
    %12 = vector.broadcast %cst_8 : f32 to vector<8x2xf32>
    %13 = arith.mulf %12, %9 : vector<8x2xf32>
    %14 = arith.select %11, %9, %13 : vector<8x2xi1>, vector<8x2xf32>
    %15 = vector.extract_strided_slice %6 {offsets = [0, 0], sizes = [8, 1], strides = [1, 1]} : vector<8x2xf32> to vector<8x1xf32>
    %c0_9 = arith.constant 0 : index
    %c0_10 = arith.constant 0 : index
    %16 = vector.load %arg5[%c0_9, %c0_10] : memref<2x8xf32, #tpu.memory_space<vmem>>, vector<1x8xf32>
    %17 = vector.broadcast %15 : vector<8x1xf32> to vector<8x8xf32>
    %18 = vector.broadcast %16 : vector<1x8xf32> to vector<8x8xf32>
    %19 = arith.addf %17, %18 : vector<8x8xf32>
    %cst_11 = arith.constant 0.000000e+00 : f32
    %20 = vector.broadcast %cst_11 : f32 to vector<8x8xf32>
    %21 = arith.cmpf ogt, %19, %20 : vector<8x8xf32>
    %cst_12 = arith.constant 2.000000e-01 : f32
    %22 = vector.broadcast %cst_12 : f32 to vector<8x8xf32>
    %23 = arith.mulf %22, %19 : vector<8x8xf32>
    %24 = arith.select %21, %19, %23 : vector<8x8xi1>, vector<8x8xf32>
    %25 = vector.extract_strided_slice %14 {offsets = [0, 0], sizes = [8, 1], strides = [1, 1]} : vector<8x2xf32> to vector<8x1xf32>
    %26 = vector.broadcast %25 : vector<8x1xf32> to vector<8x8xf32>
    %27 = arith.subf %24, %26 : vector<8x8xf32>
    %28 = math.exp %27 : vector<8x8xf32>
    %29 = arith.mulf %28, %4 : vector<8x8xf32>
    %30 = arith.truncf %29 : vector<8x8xf32> to vector<8x8xbf16>
    %c0_13 = arith.constant 0 : index
    %c0_14 = arith.constant 0 : index
    %31 = vector.load %arg10[%c0_13, %c0_14] : memref<8x33xf32, #tpu.memory_space<vmem>>, vector<8x33xf32>
    %cst_15 = arith.constant dense<0.000000e+00> : vector<8x33xf32>
    %32 = tpu.matmul %30, %5, %cst_15 {dimension_numbers = #tpu.dot_dimension_numbers<[1], [0], [0], [1], [0, 0, 1, 1], [], []>} : vector<8x8xbf16>, vector<8x33xbf16>, vector<8x33xf32> -> vector<8x33xf32>
    %33 = arith.addf %31, %32 : vector<8x33xf32>
    %c0_16 = arith.constant 0 : index
    %c0_17 = arith.constant 0 : index
    %34 = vector.load %arg10[%c0_16, %c0_17] : memref<8x33xf32, #tpu.memory_space<vmem>>, vector<8x33xf32>
    tpu.vector_store %arg10[%c0_16, %c0_17], %33 {strides = array<i32>} : memref<8x33xf32, #tpu.memory_space<vmem>>, vector<8x33xf32>,
    %35 = vector.extract_strided_slice %6 {offsets = [0, 1], sizes = [8, 1], strides = [1, 1]} : vector<8x2xf32> to vector<8x1xf32>
    %c1 = arith.constant 1 : index
    %c0_18 = arith.constant 0 : index
    %36 = vector.load %arg5[%c1, %c0_18] : memref<2x8xf32, #tpu.memory_space<vmem>>, vector<1x8xf32>
    %37 = vector.broadcast %35 : vector<8x1xf32> to vector<8x8xf32>
    %38 = vector.broadcast %36 : vector<1x8xf32> to vector<8x8xf32>
    %39 = arith.addf %37, %38 : vector<8x8xf32>
    %cst_19 = arith.constant 0.000000e+00 : f32
    %40 = vector.broadcast %cst_19 : f32 to vector<8x8xf32>
    %41 = arith.cmpf ogt, %39, %40 : vector<8x8xf32>
    %cst_20 = arith.constant 2.000000e-01 : f32
    %42 = vector.broadcast %cst_20 : f32 to vector<8x8xf32>
    %43 = arith.mulf %42, %39 : vector<8x8xf32>
    %44 = arith.select %41, %39, %43 : vector<8x8xi1>, vector<8x8xf32>
    %45 = vector.extract_strided_slice %14 {offsets = [0, 1], sizes = [8, 1], strides = [1, 1]} : vector<8x2xf32> to vector<8x1xf32>
    %46 = vector.broadcast %45 : vector<8x1xf32> to vector<8x8xf32>
    %47 = arith.subf %44, %46 : vector<8x8xf32>
    %48 = math.exp %47 : vector<8x8xf32>
    %49 = arith.mulf %48, %4 : vector<8x8xf32>
    %50 = arith.truncf %49 : vector<8x8xf32> to vector<8x8xbf16>
    %c0_21 = arith.constant 0 : index
    %c0_22 = arith.constant 0 : index
    %51 = vector.load %arg11[%c0_21, %c0_22] : memref<8x33xf32, #tpu.memory_space<vmem>>, vector<8x33xf32>
    %cst_23 = arith.constant dense<0.000000e+00> : vector<8x33xf32>
    %52 = tpu.matmul %50, %5, %cst_23 {dimension_numbers = #tpu.dot_dimension_numbers<[1], [0], [0], [1], [0, 0, 1, 1], [], []>} : vector<8x8xbf16>, vector<8x33xbf16>, vector<8x33xf32> -> vector<8x33xf32>
    %53 = arith.addf %51, %52 : vector<8x33xf32>
    %c0_24 = arith.constant 0 : index
    %c0_25 = arith.constant 0 : index
    %54 = vector.load %arg11[%c0_24, %c0_25] : memref<8x33xf32, #tpu.memory_space<vmem>>, vector<8x33xf32>
    tpu.vector_store %arg11[%c0_24, %c0_25], %53 {strides = array<i32>} : memref<8x33xf32, #tpu.memory_space<vmem>>, vector<8x33xf32>,
    %c0_i32_26 = arith.constant 0 : i32
    %55 = arith.cmpi eq, %arg1, %c0_i32_26 : i32
    %56 = arith.extui %55 : i1 to i32
    %c0_i32_27 = arith.constant 0 : i32
    %57 = arith.cmpi ne, %56, %c0_i32_27 : i32
    scf.if %57 {
      %cst_28 = arith.constant 0.000000e+00 : f32
      %58 = vector.broadcast %cst_28 : f32 to vector<8x1xf32>
      %c0_29 = arith.constant 0 : index
      %c32 = arith.constant 32 : index
      %59 = vector.load %arg10[%c0_29, %c32] : memref<8x33xf32, #tpu.memory_space<vmem>>, vector<8x1xf32>
      %cst_30 = arith.constant 1.000000e-30 : f32
      %60 = vector.broadcast %cst_30 : f32 to vector<8x1xf32>
      %61 = arith.maximumf %59, %60 : vector<8x1xf32>
      %c0_31 = arith.constant 0 : index
      %c0_32 = arith.constant 0 : index
      %62 = vector.load %arg10[%c0_31, %c0_32] : memref<8x33xf32, #tpu.memory_space<vmem>>, vector<8x16xf32>
      %63 = tpu.reciprocal %61 {approx = true} : vector<8x1xf32> -> vector<8x1xf32>
      %64 = vector.broadcast %63 : vector<8x1xf32> to vector<8x16xf32>
      %65 = arith.mulf %62, %64 : vector<8x16xf32>
      %c0_33 = arith.constant 0 : index
      %c0_34 = arith.constant 0 : index
      %66 = vector.load %arg7[%c0_33, %c0_34] : memref<1x32xf32, #tpu.memory_space<vmem>>, vector<1x16xf32>
      %67 = vector.broadcast %66 : vector<1x16xf32> to vector<8x16xf32>
      %68 = arith.addf %65, %67 : vector<8x16xf32>
      %cst_35 = arith.constant 0.000000e+00 : f32
      %69 = vector.broadcast %cst_35 : f32 to vector<8x16xf32>
      %70 = arith.maximumf %68, %69 : vector<8x16xf32>
      %c0_36 = arith.constant 0 : index
      %c0_37 = arith.constant 0 : index
      %71 = vector.load %arg8[%c0_36, %c0_37] : memref<32x1xf32, #tpu.memory_space<vmem>>, vector<16x1xf32>
      %cst_38 = arith.constant dense<0.000000e+00> : vector<8x1xf32>
      %72 = tpu.matmul %70, %71, %cst_38 {dimension_numbers = #tpu.dot_dimension_numbers<[1], [0], [0], [1], [0, 0, 1, 1], [], []>} : vector<8x16xf32>, vector<16x1xf32>, vector<8x1xf32> -> vector<8x1xf32>
      %73 = arith.addf %58, %72 : vector<8x1xf32>
      %c0_39 = arith.constant 0 : index
      %c32_40 = arith.constant 32 : index
      %74 = vector.load %arg11[%c0_39, %c32_40] : memref<8x33xf32, #tpu.memory_space<vmem>>, vector<8x1xf32>
      %cst_41 = arith.constant 1.000000e-30 : f32
      %75 = vector.broadcast %cst_41 : f32 to vector<8x1xf32>
      %76 = arith.maximumf %74, %75 : vector<8x1xf32>
      %c0_42 = arith.constant 0 : index
      %c16 = arith.constant 16 : index
      %77 = vector.load %arg11[%c0_42, %c16] : memref<8x33xf32, #tpu.memory_space<vmem>>, vector<8x16xf32>
      %78 = tpu.reciprocal %76 {approx = true} : vector<8x1xf32> -> vector<8x1xf32>
      %79 = vector.broadcast %78 : vector<8x1xf32> to vector<8x16xf32>
      %80 = arith.mulf %77, %79 : vector<8x16xf32>
      %c0_43 = arith.constant 0 : index
      %c16_44 = arith.constant 16 : index
      %81 = vector.load %arg7[%c0_43, %c16_44] : memref<1x32xf32, #tpu.memory_space<vmem>>, vector<1x16xf32>
      %82 = vector.broadcast %81 : vector<1x16xf32> to vector<8x16xf32>
      %83 = arith.addf %80, %82 : vector<8x16xf32>
      %cst_45 = arith.constant 0.000000e+00 : f32
      %84 = vector.broadcast %cst_45 : f32 to vector<8x16xf32>
      %85 = arith.maximumf %83, %84 : vector<8x16xf32>
      %c16_46 = arith.constant 16 : index
      %c0_47 = arith.constant 0 : index
      %86 = vector.load %arg8[%c16_46, %c0_47] : memref<32x1xf32, #tpu.memory_space<vmem>>, vector<16x1xf32>
      %cst_48 = arith.constant dense<0.000000e+00> : vector<8x1xf32>
      %87 = tpu.matmul %85, %86, %cst_48 {dimension_numbers = #tpu.dot_dimension_numbers<[1], [0], [0], [1], [0, 0, 1, 1], [], []>} : vector<8x16xf32>, vector<16x1xf32>, vector<8x1xf32> -> vector<8x1xf32>
      %88 = arith.addf %73, %87 : vector<8x1xf32>
      %c0_49 = arith.constant 0 : index
      %c0_50 = arith.constant 0 : index
      %89 = vector.load %arg9[%c0_49, %c0_50] : memref<8x1xf32, #tpu.memory_space<vmem>>, vector<8x1xf32>
      tpu.vector_store %arg9[%c0_49, %c0_50], %88 {strides = array<i32>} : memref<8x1xf32, #tpu.memory_space<vmem>>, vector<8x1xf32>,
    } else {
    }
    return
  }
  func.func @transform_0(%arg0: i32, %arg1: i32) -> (i32, i32) {
    %c0_i32 = arith.constant 0 : i32
    return %arg0, %arg1 : i32, i32
  }
  func.func @transform_1(%arg0: i32, %arg1: i32) -> (i32, i32) {
    %c0_i32 = arith.constant 0 : i32
    %c0_i32_0 = arith.constant 0 : i32
    return %arg0, %c0_i32 : i32, i32
  }
  func.func @transform_2(%arg0: i32, %arg1: i32) -> (i32, i32) {
    %c0_i32 = arith.constant 0 : i32
    %c0_i32_0 = arith.constant 0 : i32
    return %arg1, %c0_i32 : i32, i32
  }
  func.func @transform_3(%arg0: i32, %arg1: i32) -> (i32, i32) {
    %c0_i32 = arith.constant 0 : i32
    %c0_i32_0 = arith.constant 0 : i32
    return %c0_i32, %arg1 : i32, i32
  }
  func.func @transform_4(%arg0: i32, %arg1: i32) -> (i32, i32) {
    %c0_i32 = arith.constant 0 : i32
    %c0_i32_0 = arith.constant 0 : i32
    %c0_i32_1 = arith.constant 0 : i32
    return %c0_i32, %c0_i32_0 : i32, i32
  }
  func.func @transform_5(%arg0: i32, %arg1: i32) -> (i32, i32) {
    %c0_i32 = arith.constant 0 : i32
    %c0_i32_0 = arith.constant 0 : i32
    %c0_i32_1 = arith.constant 0 : i32
    return %c0_i32, %c0_i32_0 : i32, i32
  }
  func.func @transform_6(%arg0: i32, %arg1: i32) -> (i32, i32) {
    %c0_i32 = arith.constant 0 : i32
    %c0_i32_0 = arith.constant 0 : i32
    %c0_i32_1 = arith.constant 0 : i32
    return %c0_i32, %c0_i32_0 : i32, i32
  }
  func.func @transform_7(%arg0: i32, %arg1: i32) -> (i32, i32) {
    %c0_i32 = arith.constant 0 : i32
    %c0_i32_0 = arith.constant 0 : i32
    return %arg0, %c0_i32 : i32, i32
  }
}

module attributes {stable_mosaic.version = 11 : i64} {
  func.func @_gat2_kernel(%arg0: i32, %arg1: i32, %arg2: memref<8x8xi8, #tpu.memory_space<vmem>>, %arg3: memref<8x1xf32, #tpu.memory_space<vmem>>, %arg4: memref<1x8xf32, #tpu.memory_space<vmem>>, %arg5: memref<8x2xbf16, #tpu.memory_space<vmem>>, %arg6: memref<1x2xf32, #tpu.memory_space<vmem>>, %arg7: memref<8x1xf32, #tpu.memory_space<vmem>>, %arg8: memref<8x1xf32, #tpu.memory_space<vmem>>, %arg9: memref<8x2xf32, #tpu.memory_space<vmem>>) attributes {dimension_semantics = [#tpu.dimension_semantics<parallel>, #tpu.dimension_semantics<arbitrary>], iteration_bounds = array<i64: 1, 1>, scalar_prefetch = 0 : i64, scratch_operands = 1 : i64, tpu.core_type = #tpu.core_type<tc>, window_params = [{transform_indices = @transform_0, window_bounds = array<i64: 8, 8>}, {transform_indices = @transform_1, window_bounds = array<i64: 8, 1>}, {transform_indices = @transform_2, window_bounds = array<i64: 1, 8>}, {transform_indices = @transform_3, window_bounds = array<i64: 8, 2>}, {pipeline_mode = #tpu.pipeline_mode<synchronous>, transform_indices = @transform_4, window_bounds = array<i64: 1, 2>}, {transform_indices = @transform_5, window_bounds = array<i64: 8, 1>}, {transform_indices = @transform_6, window_bounds = array<i64: 8, 1>}]} {
    %c0_i32 = arith.constant 0 : i32
    %0 = arith.cmpi eq, %arg1, %c0_i32 : i32
    %1 = arith.extui %0 : i1 to i32
    %c0_i32_0 = arith.constant 0 : i32
    %2 = arith.cmpi ne, %1, %c0_i32_0 : i32
    scf.if %2 {
      %cst_22 = arith.constant 0.000000e+00 : f32
      %37 = vector.broadcast %cst_22 : f32 to vector<8x2xf32>
      %c0_23 = arith.constant 0 : index
      %c0_24 = arith.constant 0 : index
      %38 = vector.load %arg9[%c0_23, %c0_24] : memref<8x2xf32, #tpu.memory_space<vmem>>, vector<8x2xf32>
      tpu.vector_store %arg9[%c0_23, %c0_24], %37 {strides = array<i32>} : memref<8x2xf32, #tpu.memory_space<vmem>>, vector<8x2xf32>,
    } else {
    }
    %c0 = arith.constant 0 : index
    %c0_1 = arith.constant 0 : index
    %3 = vector.load %arg2[%c0, %c0_1] : memref<8x8xi8, #tpu.memory_space<vmem>>, vector<8x8xi8>
    %4 = arith.sitofp %3 : vector<8x8xi8> to vector<8x8xf32>
    %c0_2 = arith.constant 0 : index
    %c0_3 = arith.constant 0 : index
    %5 = vector.load %arg3[%c0_2, %c0_3] : memref<8x1xf32, #tpu.memory_space<vmem>>, vector<8x1xf32>
    %c0_4 = arith.constant 0 : index
    %c0_5 = arith.constant 0 : index
    %6 = vector.load %arg4[%c0_4, %c0_5] : memref<1x8xf32, #tpu.memory_space<vmem>>, vector<1x8xf32>
    %7 = vector.broadcast %5 : vector<8x1xf32> to vector<8x8xf32>
    %8 = vector.broadcast %6 : vector<1x8xf32> to vector<8x8xf32>
    %9 = arith.addf %7, %8 : vector<8x8xf32>
    %cst = arith.constant 0.000000e+00 : f32
    %10 = vector.broadcast %cst : f32 to vector<8x8xf32>
    %11 = arith.cmpf ogt, %9, %10 : vector<8x8xf32>
    %cst_6 = arith.constant 2.000000e-01 : f32
    %12 = vector.broadcast %cst_6 : f32 to vector<8x8xf32>
    %13 = arith.mulf %12, %9 : vector<8x8xf32>
    %14 = arith.select %11, %9, %13 : vector<8x8xi1>, vector<8x8xf32>
    %c0_7 = arith.constant 0 : index
    %c0_8 = arith.constant 0 : index
    %15 = vector.load %arg3[%c0_7, %c0_8] : memref<8x1xf32, #tpu.memory_space<vmem>>, vector<8x1xf32>
    %c0_9 = arith.constant 0 : index
    %c0_10 = arith.constant 0 : index
    %16 = vector.load %arg6[%c0_9, %c0_10] : memref<1x2xf32, #tpu.memory_space<vmem>>, vector<1x1xf32>
    %17 = vector.broadcast %16 : vector<1x1xf32> to vector<8x1xf32>
    %18 = arith.addf %15, %17 : vector<8x1xf32>
    %cst_11 = arith.constant 0.000000e+00 : f32
    %19 = vector.broadcast %cst_11 : f32 to vector<8x1xf32>
    %20 = arith.cmpf ogt, %18, %19 : vector<8x1xf32>
    %cst_12 = arith.constant 2.000000e-01 : f32
    %21 = vector.broadcast %cst_12 : f32 to vector<8x1xf32>
    %22 = arith.mulf %21, %18 : vector<8x1xf32>
    %23 = arith.select %20, %18, %22 : vector<8x1xi1>, vector<8x1xf32>
    %24 = vector.broadcast %23 : vector<8x1xf32> to vector<8x8xf32>
    %25 = arith.subf %14, %24 : vector<8x8xf32>
    %26 = math.exp %25 : vector<8x8xf32>
    %27 = arith.mulf %26, %4 : vector<8x8xf32>
    %28 = arith.truncf %27 : vector<8x8xf32> to vector<8x8xbf16>
    %c0_13 = arith.constant 0 : index
    %c0_14 = arith.constant 0 : index
    %29 = vector.load %arg9[%c0_13, %c0_14] : memref<8x2xf32, #tpu.memory_space<vmem>>, vector<8x2xf32>
    %c0_15 = arith.constant 0 : index
    %c0_16 = arith.constant 0 : index
    %30 = vector.load %arg5[%c0_15, %c0_16] : memref<8x2xbf16, #tpu.memory_space<vmem>>, vector<8x2xbf16>
    %cst_17 = arith.constant dense<0.000000e+00> : vector<8x2xf32>
    %31 = tpu.matmul %28, %30, %cst_17 {dimension_numbers = #tpu.dot_dimension_numbers<[1], [0], [0], [1], [0, 0, 1, 1], [], []>} : vector<8x8xbf16>, vector<8x2xbf16>, vector<8x2xf32> -> vector<8x2xf32>
    %32 = arith.addf %29, %31 : vector<8x2xf32>
    %c0_18 = arith.constant 0 : index
    %c0_19 = arith.constant 0 : index
    %33 = vector.load %arg9[%c0_18, %c0_19] : memref<8x2xf32, #tpu.memory_space<vmem>>, vector<8x2xf32>
    tpu.vector_store %arg9[%c0_18, %c0_19], %32 {strides = array<i32>} : memref<8x2xf32, #tpu.memory_space<vmem>>, vector<8x2xf32>,
    %c0_i32_20 = arith.constant 0 : i32
    %34 = arith.cmpi eq, %arg1, %c0_i32_20 : i32
    %35 = arith.extui %34 : i1 to i32
    %c0_i32_21 = arith.constant 0 : i32
    %36 = arith.cmpi ne, %35, %c0_i32_21 : i32
    scf.if %36 {
      %c0_22 = arith.constant 0 : index
      %c1 = arith.constant 1 : index
      %37 = vector.load %arg9[%c0_22, %c1] : memref<8x2xf32, #tpu.memory_space<vmem>>, vector<8x1xf32>
      %cst_23 = arith.constant 1.000000e-30 : f32
      %38 = vector.broadcast %cst_23 : f32 to vector<8x1xf32>
      %39 = arith.maximumf %37, %38 : vector<8x1xf32>
      %c0_24 = arith.constant 0 : index
      %c0_25 = arith.constant 0 : index
      %40 = vector.load %arg9[%c0_24, %c0_25] : memref<8x2xf32, #tpu.memory_space<vmem>>, vector<8x1xf32>
      %41 = tpu.reciprocal %39 {approx = true} : vector<8x1xf32> -> vector<8x1xf32>
      %42 = arith.mulf %40, %41 : vector<8x1xf32>
      %c0_26 = arith.constant 0 : index
      %c1_27 = arith.constant 1 : index
      %43 = vector.load %arg6[%c0_26, %c1_27] : memref<1x2xf32, #tpu.memory_space<vmem>>, vector<1x1xf32>
      %44 = vector.broadcast %43 : vector<1x1xf32> to vector<8x1xf32>
      %45 = arith.addf %42, %44 : vector<8x1xf32>
      %c0_28 = arith.constant 0 : index
      %c0_29 = arith.constant 0 : index
      %46 = vector.load %arg7[%c0_28, %c0_29] : memref<8x1xf32, #tpu.memory_space<vmem>>, vector<8x1xf32>
      %47 = arith.mulf %45, %46 : vector<8x1xf32>
      %c0_30 = arith.constant 0 : index
      %c0_31 = arith.constant 0 : index
      %48 = vector.load %arg8[%c0_30, %c0_31] : memref<8x1xf32, #tpu.memory_space<vmem>>, vector<8x1xf32>
      tpu.vector_store %arg8[%c0_30, %c0_31], %47 {strides = array<i32>} : memref<8x1xf32, #tpu.memory_space<vmem>>, vector<8x1xf32>,
    } else {
    }
    return
  }
  func.func @transform_0(%arg0: i32, %arg1: i32) -> (i32, i32) {
    %c0_i32 = arith.constant 0 : i32
    return %arg0, %arg1 : i32, i32
  }
  func.func @transform_1(%arg0: i32, %arg1: i32) -> (i32, i32) {
    %c0_i32 = arith.constant 0 : i32
    %c0_i32_0 = arith.constant 0 : i32
    return %arg0, %c0_i32 : i32, i32
  }
  func.func @transform_2(%arg0: i32, %arg1: i32) -> (i32, i32) {
    %c0_i32 = arith.constant 0 : i32
    %c0_i32_0 = arith.constant 0 : i32
    return %c0_i32, %arg1 : i32, i32
  }
  func.func @transform_3(%arg0: i32, %arg1: i32) -> (i32, i32) {
    %c0_i32 = arith.constant 0 : i32
    %c0_i32_0 = arith.constant 0 : i32
    return %arg1, %c0_i32 : i32, i32
  }
  func.func @transform_4(%arg0: i32, %arg1: i32) -> (i32, i32) {
    %c0_i32 = arith.constant 0 : i32
    %c0_i32_0 = arith.constant 0 : i32
    %c0_i32_1 = arith.constant 0 : i32
    return %c0_i32, %c0_i32_0 : i32, i32
  }
  func.func @transform_5(%arg0: i32, %arg1: i32) -> (i32, i32) {
    %c0_i32 = arith.constant 0 : i32
    %c0_i32_0 = arith.constant 0 : i32
    return %arg0, %c0_i32 : i32, i32
  }
  func.func @transform_6(%arg0: i32, %arg1: i32) -> (i32, i32) {
    %c0_i32 = arith.constant 0 : i32
    %c0_i32_0 = arith.constant 0 : i32
    return %arg0, %c0_i32 : i32, i32
  }
}

</mosaic_0001>

<bundles_post_ra>
// kernel: critic_forward.3
= control target key start
LH: loop header
LB: loop body
LE: loop exit
PB: predicated region body
PF: predicated region fallthrough
CT: control target
= control target key end

     0   :  { %vm20_vm0 = vcmask 1044480   ;;  %vm16_vm1 = vcmask 39936   ;;  %v132_v0 = vmov 0.0   ;;  %vm133_vm2 = vmmov 0   ;;  %s134_s19 = smov 95   ;;  %s135_s22 = smov 93   ;;  %s176_s1 = inlined_call_operand.vmem [shape: f32[5,37], index: 1, kind: input, shape index: {}]   ;;  %s177_s0 = inlined_call_operand.vmem [shape: f32[8,5], index: 0, kind: input, shape index: {}]   ;;  %s178_s2 = inlined_call_operand.vmem [shape: bf16[8,33], index: 2, kind: output, shape index: {0}]   ;;  %s179_s3 = inlined_call_operand.vmem [shape: f32[8,2], index: 3, kind: output, shape index: {1}]   ;;  %s180_s4 = inlined_call_operand.vmem [shape: f32[8,2], index: 4, kind: output, shape index: {2}]  }
   0x1   :  { %123 = vmatprep.subr.mxu0 %v132_v0  ;;  %v15_v1 = vld [vmem:[%s176_s1] sm:$0x1f]  ;;  %125 = vmatprep.mubr.msk.f32.mxu0 %vm133_vm2, %v132_v0  ;;  %vm95_vm3 = vcmask 265216   ;;  %vm101_vm4 = vcmask 15360  }
   0x2   :  { %v14_v2 = vld [vmem:[%s177_s0] sm:$0xff]  ;;  %124 = vmatpush3.msk.msra.mxu0 %vm20_vm0, %v15_v1 }
   0x3   :  { %126 = vmatmul.mubr.msk.f32.vlgmr.msra.gmra.mrb[0].mxu0 %vm16_vm1, %v14_v2 }
  0xd6   :  { %v90_v3 = vpop.f32.mrb[0].mxu0 }
  0xd7   :  { %v94_v4 = vpack.c.bf16 %v90_v3, %v90_v3  ;;  %98 = vrot.lane.b32.xlu0 %v90_v3, %s134_s19  ;;  %v127_v5 = vpop.f32.mrb[1].mxu0 }
  0xd9   :  { %96 = vst.msk [vmem:[%s178_s2] sm:$0xf] %vm95_vm3, %v94_v4 }
  0xdb   :  { %103 = vrot.lane.b32.xlu0 %v90_v3, %s135_s22 }
 0x149   :  { %v99_v6 = vpop.permute.xlu0 %98 }
 0x14a   :  { %102 = vst.msk [vmem:[%s179_s3] sm:$0xff] %vm101_vm4, %v99_v6 }
 0x14d   :  { %v104_v7 = vpop.permute.xlu0 %103 }
 0x14e   :  { %106 = vst.msk [vmem:[%s180_s4] sm:$0xff] %vm101_vm4, %v104_v7 }

// kernel: critic_forward.4
= control target key start
LH: loop header
LB: loop body
LE: loop exit
PB: predicated region body
PF: predicated region fallthrough
CT: control target
= control target key end

     0   :  { %v455_v0 = vmov 1   ;;  %v456_v1 = vmov 0   ;;  %vm79_vm1 = vcmask 1043456   ;;  %v457_v7 = vmov 0.0   ;;  %s461_s18 = smov 112   ;;  %s546_s1 = inlined_call_operand.vmem [shape: f32[8,2], index: 1, kind: input, shape index: {}]   ;;  %s547_s4 = inlined_call_operand.vmem [shape: f32[1,2], index: 4, kind: input, shape index: {}]   ;;  %s548_s2 = inlined_call_operand.vmem [shape: bf16[8,33], index: 2, kind: input, shape index: {}]   ;;  %s549_s3 = inlined_call_operand.vmem [shape: f32[2,8], index: 3, kind: input, shape index: {}]   ;;  %s550_s0 = inlined_call_operand.vmem [shape: s8[8,8], index: 0, kind: input, shape index: {}]   ;;  %s551_s6 = inlined_call_operand.vmem [shape: f32[32,1], index: 6, kind: input, shape index: {}]   ;;  %s552_s5 = inlined_call_operand.vmem [shape: f32[1,32], index: 5, kind: input, shape index: {}]   ;;  %s553_s7 = inlined_call_operand.vmem [shape: f32[8,1], index: 7, kind: output, shape index: {}]  }
   0x1   :  { %443 = vset.pattern.permute.xlu0 %v455_v0  ;;  %444 = vset.pattern.permute.xlu1 %v456_v1  ;;  %v38_v2 = vld [vmem:[%s546_s1] sm:$0xff]  ;;  %vm458_vm2 = vmmov 0   ;;  %vm31_vm3 = vcmask 269312   ;;  %vm75_vm6 = vcmask 64512   ;;  %v459_v35 = vmov 32   ;;  %v216_v55 = vld [vmem:[%s551_s6 + $0x8] sm:$0xff] }
   0x2   :  { %v385_v3 = vld [vmem:[%s547_s4] ss:$0 sm:$0xff]  ;;  %53 = vperm.xlu1 %444, %v38_v2   ;;  %128 = vperm.xlu0 %443, %v38_v2   ;;  %32 = vst.msk [vmem:[#allocation2] sm:$0xff] %vm31_vm3, %v457_v7  ;;  %33 = vst.msk [vmem:[#allocation3] sm:$0xff] %vm31_vm3, %v457_v7  ;;  %v388_v11 = vld [vmem:[%s549_s3 + $0x1] ss:$0 sm:$0xff] }
   0x3   :  { %v46_v4 = vadd.f32 %v385_v3, %v38_v2  ;;  %403 = vmatprep.subr.bf16.mxu0 %v457_v7  ;;  %409 = vmatprep.subr.bf16.mxu1 %v457_v7  ;;  %v37_v8 = vld [vmem:[%s548_s2] sm:$0xf]  ;;  %v460_v57 = vmov 0.0|0.0   ;;  %v228_v58 = vld [vmem:[%s551_s6 + $0x10] sm:$0xff]  ;;  %v229_v59 = vld [vmem:[%s551_s6 + $0x18] sm:$0xff]  ;;  %vm233_vm7 = vcmask 130048  }
   0x4   :  { %v81_v9 = vsel %vm79_vm1, %v37_v8, 0  ;;  %405 = vmatprep.mubr.msk.bf16.mxu0 %vm458_vm2, %v457_v7  ;;  %411 = vmatprep.mubr.msk.bf16.mxu1 %vm458_vm2, %v457_v7  ;;  %v386_v10 = vld [vmem:[%s549_s3] ss:$0 sm:$0xff]  ;;  %v430_v60 = vpack.c.bf16 %v229_v59, %v228_v58  ;;  %vm379_vm8 = vcmask 7168  }
   0x5   :  { %vm47_vm0 = vcmp.gt.f32.partialorder %v46_v4, 0.0  ;;  %v48_v5 = vmul.f32 0.2, %v46_v4  ;;  %404 = vmatpush3.bf16.msra.mxu0 %v81_v9  ;;  %410 = vmatpush3.bf16.msra.mxu1 %v81_v9  ;;  %v34_v26 = vld [vmem:[%s550_s0] sm:$0x3] }
   0x6   :  { %v35_v27 = vunpack.c.0.s8 %v34_v26  ;;  %v215_v54 = vld [vmem:[%s551_s6] sm:$0xff]  ;;  %432 = vmatprep.subr.bf16.mxu0 %v460_v57  ;;  %429 = vmatprep.subr.bf16.mxu1 %v460_v57 }
   0x7   :  { %v49_v6 = vsel %vm47_vm0, %v46_v4, %v48_v5  ;;  %v433_v56 = vpack.c.bf16 %v216_v55, %v215_v54  ;;  %v390_v61 = vld [vmem:[%s552_s5] ss:$0 sm:$0xff] }
   0x8   :  { %66 = vperm.xlu1 %444, %v49_v6   ;;  %140 = vperm.xlu0 %443, %v49_v6   ;;  %v36_v28 = vcvt.s32.f32 %v35_v27 }
   0x9   :  { %v74_v36 = vld [vmem:[#allocation2] sm:$0xff]  ;;  %v148_v37 = vld [vmem:[#allocation3] sm:$0xff] }
   0xc   :  { %446 = vset.pattern.permute.xlu1 %v459_v35  ;;  %445 = vset.pattern.permute.xlu0 %v459_v35 }
  0x81   :  { %v54_v12 = vpop.permute.xlu1 %53  ;;  %v129_v13 = vpop.permute.xlu0 %128 }
  0x82   :  { %v60_v14 = vadd.f32 %v386_v10, %v54_v12  ;;  %v135_v15 = vadd.f32 %v388_v11, %v129_v13 }
  0x84   :  { %v62_v16 = vmul.f32 0.2, %v60_v14  ;;  %v137_v17 = vmul.f32 0.2, %v135_v15  ;;  %vm61_vm4 = vcmp.gt.f32.partialorder %v60_v14, 0.0  ;;  %vm136_vm5 = vcmp.gt.f32.partialorder %v135_v15, 0.0 }
  0x86   :  { %v63_v18 = vsel %vm61_vm4, %v60_v14, %v62_v16  ;;  %v138_v20 = vsel %vm136_vm5, %v135_v15, %v137_v17 }
  0x87   :  { %v67_v19 = vpop.permute.xlu1 %66  ;;  %v141_v21 = vpop.permute.xlu0 %140 }
  0x88   :  { %v69_v22 = vsub.f32 %v63_v18, %v67_v19  ;;  %v143_v23 = vsub.f32 %v138_v20, %v141_v21 }
  0x8a   :  { %v70_v24 = vmul.f32 1.442695, %v69_v22  ;;  %v144_v25 = vmul.f32 1.442695, %v143_v23 }
  0x8c   :  { %447 = vpow2.f32 %v70_v24 }
  0x8d   :  { %449 = vpow2.f32 %v144_v25 }
  0x96   :  { %v448_v29 = vpop.eup %447 }
  0x97   :  { %v450_v30 = vpop.eup %449  ;;  %v72_v31 = vmul.f32 %v448_v29, %v36_v28 }
  0x98   :  { %v146_v32 = vmul.f32 %v450_v30, %v36_v28 }
  0x99   :  { %v73_v33 = vpack.c.bf16 %v72_v31, %v72_v31 }
  0x9a   :  { %v147_v34 = vpack.c.bf16 %v146_v32, %v146_v32 }
  0x9b   :  { %406 = vmatmul.mubr.msk.bf16.vlgmr.msra.gmra.mrb[0].mxu0 %vm75_vm6, %v73_v33 }
  0x9c   :  { %412 = vmatmul.mubr.msk.bf16.vlgmr.msra.gmra.mrb[0].mxu1 %vm75_vm6, %v147_v34  ;;  %426 = vmatprep.mubr.msk.f32.mxu0 %vm458_vm2, %v457_v7 }
  0x9d   :  { %419 = vmatprep.mubr.msk.f32.mxu1 %vm458_vm2, %v457_v7  ;;  %434 = vmatpush3.bf16.msra.mxu0 %v433_v56 }
  0x9e   :  { %431 = vmatpush3.bf16.msra.mxu1 %v430_v60 }
 0x16e   :  { %v117_v38 = vpop.f32.mrb[0].mxu0 }
 0x16f   :  { %v123_v39 = vadd.f32 %v117_v38, %v74_v36  ;;  %v186_v40 = vpop.f32.mrb[0].mxu1  ;;  %v407_v41 = vpop.f32.mrb[1].mxu0 }
 0x170   :  { %v192_v42 = vadd.f32 %v186_v40, %v148_v37  ;;  %v413_v43 = vpop.f32.mrb[1].mxu1  ;;  %v120_v44 = vpop.f32.mrb[2].mxu0 }
 0x171   :  { %125 = vst.msk [vmem:[#allocation2] sm:$0xff] %vm31_vm3, %v123_v39  ;;  %v189_v45 = vpop.f32.mrb[2].mxu1  ;;  %v408_v46 = vpop.f32.mrb[3].mxu0 }
 0x172   :  { %193 = vst.msk [vmem:[#allocation3] sm:$0xff] %vm31_vm3, %v192_v42  ;;  %v414_v47 = vpop.f32.mrb[3].mxu1 }
 0x178   :  { %v197_v48 = vld [vmem:[#allocation2] sm:$0xff] }
 0x179   :  { %v217_v49 = vld [vmem:[#allocation3] sm:$0xff]  ;;  %v198_v50 = vmax.f32 %v197_v48, 1e-30 }
 0x17a   :  { %v218_v51 = vmax.f32 %v217_v49, 1e-30 }
 0x17b   :  { %451 = vrcp.f32 %v198_v50 }
 0x17c   :  { %453 = vrcp.f32 %v218_v51 }
 0x185   :  { %v452_v52 = vpop.eup %451 }
 0x186   :  { %v454_v53 = vpop.eup %453  ;;  %202 = vperm.xlu1 %446, %v452_v52  }
 0x187   :  { %222 = vperm.xlu0 %445, %v454_v53  }
 0x205   :  { %v203_v62 = vpop.permute.xlu1 %202 }
 0x206   :  { %v223_v63 = vpop.permute.xlu0 %222  ;;  %v205_v0 = vmul.f32 %v203_v62, %v197_v48 }
 0x207   :  { %v225_v1 = vmul.f32 %v223_v63, %v217_v49 }
 0x208   :  { %v213_v2 = vadd.f32 %v390_v61, %v205_v0 }
 0x209   :  { %v226_v3 = vadd.f32 %v390_v61, %v225_v1 }
 0x20a   :  { %v214_v4 = vmax.f32 %v213_v2, 0.0 }
 0x20b   :  { %v227_v5 = vmax.f32 %v226_v3, 0.0 }
 0x20c   :  { %427 = vmatmul.mubr.msk.f32.vlgmr.msra.gmra.mrb[4].mxu0 %vm233_vm7, %v214_v4 }
 0x20d   :  { %231 = vrot.lane.b32.xlu1 %v227_v5, %s461_s18 }
 0x27f   :  { %v232_v6 = vpop.permute.xlu1 %231 }
 0x280   :  { %420 = vmatmul.mubr.msk.f32.vlgmr.msra.gmra.mrb[4].mxu1 %vm233_vm7, %v232_v6 }
 0x2df   :  { %v375_v7 = vpop.f32.mrb[4].mxu0 }
 0x2e0   :  { %v428_v8 = vpop.f32.mrb[5].mxu0 }
 0x353   :  { %v302_v9 = vpop.f32.mrb[4].mxu1 }
 0x354   :  { %v376_v10 = vadd.f32 %v375_v7, %v302_v9  ;;  %v421_v11 = vpop.f32.mrb[5].mxu1 }
 0x356   :  { %380 = vst.msk [vmem:[%s553_s7] sm:$0xff] %vm379_vm8, %v376_v10 }

// kernel: critic_forward.5
= control target key start
LH: loop header
LB: loop body
LE: loop exit
PB: predicated region body
PF: predicated region fallthrough
CT: control target
= control target key end

     0   :  { %v174_v0 = vmov 0   ;;  %vm28_vm1 = vcmask 15360   ;;  %vm77_vm2 = vcmask 1043456   ;;  %v175_v6 = vmov 0.0   ;;  %s236_s1 = inlined_call_operand.vmem [shape: f32[8,1], index: 1, kind: input, shape index: {}]   ;;  %s237_s4 = inlined_call_operand.vmem [shape: f32[1,2], index: 4, kind: input, shape index: {}]   ;;  %s238_s3 = inlined_call_operand.vmem [shape: bf16[8,2], index: 3, kind: input, shape index: {}]   ;;  %s239_s2 = inlined_call_operand.vmem [shape: f32[1,8], index: 2, kind: input, shape index: {}]   ;;  %s240_s0 = inlined_call_operand.vmem [shape: s8[8,8], index: 0, kind: input, shape index: {}]   ;;  %s241_s5 = inlined_call_operand.vmem [shape: f32[8,1], index: 5, kind: input, shape index: {}]   ;;  %s242_s6 = inlined_call_operand.vmem [shape: f32[8,1], index: 6, kind: output, shape index: {}]  }
   0x1   :  { %169 = vset.pattern.permute.xlu0 %v174_v0  ;;  %v33_v1 = vld [vmem:[%s236_s1] sm:$0xff]  ;;  %29 = vst.msk [vmem:[#allocation2] sm:$0xff] %vm28_vm1, %v175_v6  ;;  %159 = vmatprep.subr.bf16.mxu0 %v175_v6  ;;  %vm176_vm3 = vmmov 0   ;;  %vm73_vm5 = vcmask 64512   ;;  %vm147_vm6 = vcmask 7168  }
   0x2   :  { %v154_v2 = vld [vmem:[%s237_s4] ss:$0 sm:$0xff]  ;;  %37 = vperm.xlu0 %169, %v33_v1   ;;  %161 = vmatprep.mubr.msk.bf16.mxu0 %vm176_vm3, %v175_v6 }
   0x3   :  { %v57_v3 = vadd.f32 %v154_v2, %v33_v1  ;;  %v72_v7 = vld [vmem:[%s238_s3] sm:$0xf] }
   0x4   :  { %v79_v8 = vsel %vm77_vm2, %v72_v7, 0  ;;  %v153_v9 = vld [vmem:[%s239_s2] ss:$0 sm:$0xff] }
   0x5   :  { %v59_v4 = vmul.f32 0.2, %v57_v3  ;;  %vm58_vm0 = vcmp.gt.f32.partialorder %v57_v3, 0.0  ;;  %160 = vmatpush3.bf16.msra.mxu0 %v79_v8  ;;  %v30_v17 = vld [vmem:[%s240_s0] sm:$0x3]  ;;  %s177_s0 = smov 127  }
   0x6   :  { %v31_v18 = vunpack.c.0.s8 %v30_v17  ;;  %v145_v34 = vld [vmem:[%s241_s5] sm:$0xff] }
   0x7   :  { %v60_v5 = vsel %vm58_vm0, %v57_v3, %v59_v4 }
   0x8   :  { %63 = vperm.xlu0 %169, %v60_v5   ;;  %v32_v19 = vcvt.s32.f32 %v31_v18  ;;  %v71_v23 = vld [vmem:[#allocation2] sm:$0xff] }
  0x81   :  { %v38_v10 = vpop.permute.xlu0 %37 }
  0x82   :  { %v46_v11 = vadd.f32 %v153_v9, %v38_v10 }
  0x84   :  { %v48_v12 = vmul.f32 0.2, %v46_v11  ;;  %vm47_vm4 = vcmp.gt.f32.partialorder %v46_v11, 0.0 }
  0x86   :  { %v49_v13 = vsel %vm47_vm4, %v46_v11, %v48_v12 }
  0x87   :  { %v64_v14 = vpop.permute.xlu0 %63 }
  0x88   :  { %v66_v15 = vsub.f32 %v49_v13, %v64_v14 }
  0x8a   :  { %v67_v16 = vmul.f32 1.442695, %v66_v15 }
  0x8c   :  { %170 = vpow2.f32 %v67_v16 }
  0x96   :  { %v171_v20 = vpop.eup %170 }
  0x97   :  { %v69_v21 = vmul.f32 %v171_v20, %v32_v19 }
  0x99   :  { %v70_v22 = vpack.c.bf16 %v69_v21, %v69_v21 }
  0x9b   :  { %162 = vmatmul.mubr.msk.bf16.vlgmr.msra.gmra.mrb[0].mxu0 %vm73_vm5, %v70_v22 }
 0x16e   :  { %v115_v24 = vpop.f32.mrb[0].mxu0 }
 0x16f   :  { %v121_v25 = vadd.f32 %v115_v24, %v71_v23  ;;  %v163_v26 = vpop.f32.mrb[1].mxu0 }
 0x170   :  { %v118_v27 = vpop.f32.mrb[2].mxu0 }
 0x171   :  { %123 = vst.msk [vmem:[#allocation2] sm:$0xff] %vm28_vm1, %v121_v25  ;;  %v164_v28 = vpop.f32.mrb[3].mxu0 }
 0x178   :  { %v127_v29 = vld [vmem:[#allocation2] sm:$0xff] }
 0x179   :  { %v128_v30 = vmax.f32 %v127_v29, 1e-30 }
 0x17b   :  { %172 = vrcp.f32 %v128_v30 }
 0x185   :  { %v173_v31 = vpop.eup %172 }
 0x186   :  { %131 = vrot.lane.b32.xlu1 %v173_v31, %s177_s0 }
 0x18a   :  { %141 = vrot.lane.b32.xlu1 %v154_v2, %s177_s0 }
 0x1f8   :  { %v132_v32 = vpop.permute.xlu1 %131 }
 0x1f9   :  { %v134_v33 = vmul.f32 %v132_v32, %v127_v29 }
 0x1fc   :  { %v142_v35 = vpop.permute.xlu1 %141 }
 0x1fd   :  { %v144_v36 = vadd.f32 %v142_v35, %v134_v33 }
 0x1ff   :  { %v146_v37 = vmul.f32 %v145_v34, %v144_v36 }
 0x201   :  { %148 = vst.msk [vmem:[%s242_s6] sm:$0xff] %vm147_vm6, %v146_v37 }

</bundles_post_ra>
